<compile_context>
chip_gen: v7x
topology: tpu7x:2x2x1
jax: 0.10.0
libtpu: 0.0.40
codegen_flags: <defaults>
</compile_context>

<pallas_src>
import jax
import jax.numpy as jnp
from jax.experimental import pallas as pl
from jax.experimental.pallas import tpu as pltpu


def _round_up(x, m):
    return (x + m - 1) // m * m


def tlstm3_kernel(zht_ref, c_ref, w_ref, b_ref, peep_ref, out_ref):
    """One fused TLSTM3 step for a batch tile.

    zht  : (bm, Kp)      [x | h | t | 0-pad], MXU operand dtype (bf16 or f32)
    c    : (bm, Hp)      f32, lanes >= H are zero
    w    : (Kp, 8*Hp)    fused weights; column blocks = [i, o, c, x1, x2, t1, t2, to]
    b    : (1, 8*Hp)     f32 fused bias row (W_all / U_all biases pre-summed)
    peep : (8, Hp)       f32, rows 0/1 = [W_ci, W_co]
    out  : (bm, 2*Hp)    f32, [new_h | c_tilde] (meaningful lanes: first H of each block)
    """
    f32 = jnp.float32
    Hp = c_ref.shape[1]

    c = c_ref[...]

    # Single lane-dense MXU matmul covering every linear projection in the unit;
    # f32 accumulate, bias added post-accumulation in f32.
    g = jnp.dot(zht_ref[...], w_ref[...], preferred_element_type=f32) + b_ref[...]

    i_lin = g[:, 0 * Hp:1 * Hp]
    o_lin = g[:, 1 * Hp:2 * Hp]
    c_lin = g[:, 2 * Hp:3 * Hp]
    x1 = g[:, 3 * Hp:4 * Hp]
    x2 = g[:, 4 * Hp:5 * Hp]
    t1 = g[:, 5 * Hp:6 * Hp]      # W_t1(t)   (K=1 projection folded into the matmul)
    t2 = g[:, 6 * Hp:7 * Hp]      # W_t2(t)
    to = g[:, 7 * Hp:8 * Hp]      # W_to(t)

    w_ci = peep_ref[0:1, :]
    w_co = peep_ref[1:2, :]

    # All gating / transcendental math in f32 (v5e-safe).
    # TODO(synk): on v6e/v7x this block could run in bf16 to double EUP throughput.
    T1 = jax.nn.sigmoid(jnp.tanh(t1) + x1)
    T2 = jax.nn.sigmoid(jnp.tanh(t2) + x2)

    i_g = jax.nn.sigmoid(i_lin + c * w_ci)
    c_tmp = jnp.tanh(c_lin)

    cell = (1.0 - i_g) * c + i_g * T2 * c_tmp
    c_tilde = (1.0 - i_g * T1) * c + i_g * T1 * c_tmp

    o_g = jax.nn.sigmoid(o_lin + c_tilde * w_co + to)
    new_h = o_g * jnp.tanh(cell)

    # Lane-dense (128-aligned, 128-multiple wide) unmasked stores.
    out_ref[:, 0:Hp] = new_h.astype(out_ref.dtype)
    out_ref[:, Hp:2 * Hp] = c_tilde.astype(out_ref.dtype)


def fuse_params(p, input_dim, hidden_dim, matmul_dtype=jnp.bfloat16):
    """Pack per-layer parameters into the lane-dense slabs the kernel consumes."""
    D, H = input_dim, hidden_dim
    K = D + H + 1
    Kp = _round_up(K, 128)   # clean LHS lanes and RHS sublanes for the fused matmul
    Hp = _round_up(H, 128)   # each gate block becomes a 128-lane-aligned slice

    w = jnp.zeros((Kp, 8 * Hp), jnp.float32)

    def put(rows, blk, val):
        return w.at[rows, blk * Hp: blk * Hp + val.shape[1]].set(val)

    # x rows (0:D): i, o, c from W_all; x1, x2 from W_x1 / W_x2.
    w = put(slice(0, D), 0, p["w_all"][:, 0 * H:1 * H])
    w = put(slice(0, D), 1, p["w_all"][:, 1 * H:2 * H])
    w = put(slice(0, D), 2, p["w_all"][:, 2 * H:3 * H])
    w = put(slice(0, D), 3, p["w_x1"])
    w = put(slice(0, D), 4, p["w_x2"])
    # h rows (D:D+H): i, o, c from U_all.
    w = put(slice(D, D + H), 0, p["u_all"][:, 0 * H:1 * H])
    w = put(slice(D, D + H), 1, p["u_all"][:, 1 * H:2 * H])
    w = put(slice(D, D + H), 2, p["u_all"][:, 2 * H:3 * H])
    # t row (D+H): t1, t2, to.
    w = put(slice(D + H, D + H + 1), 5, p["w_t1"])
    w = put(slice(D + H, D + H + 1), 6, p["w_t2"])
    w = put(slice(D + H, D + H + 1), 7, p["w_to"])

    b = jnp.zeros((1, 8 * Hp), jnp.float32)
    bias_blocks = [
        p["b_all"][:, 0 * H:1 * H] + p["bu_all"][:, 0 * H:1 * H],
        p["b_all"][:, 1 * H:2 * H] + p["bu_all"][:, 1 * H:2 * H],
        p["b_all"][:, 2 * H:3 * H] + p["bu_all"][:, 2 * H:3 * H],
        p["b_x1"], p["b_x2"], p["b_t1"], p["b_t2"], p["b_to"],
    ]
    for blk, bb in enumerate(bias_blocks):
        b = b.at[:, blk * Hp: blk * Hp + H].set(bb)

    peep = jnp.zeros((8, Hp), jnp.float32)
    peep = peep.at[0, :H].set(p["w_ci"][0])
    peep = peep.at[1, :H].set(p["w_co"][0])

    return {
        "w": w.astype(matmul_dtype), "b": b, "peep": peep,
        "D": D, "H": H, "Kp": Kp, "Hp": Hp, "dtype": matmul_dtype,
    }


def tlstm3_unit(h, c, x, t, fused):
    """Pallas wrapper for one TLSTM3_Unit forward step. Returns (new_h, c_tilde)."""
    B, H = h.shape
    D, Kp, Hp = fused["D"], fused["Kp"], fused["Hp"]
    K = D + H + 1
    dtype = fused["dtype"]

    # [x | h | t], zero-padded to Kp on the contraction dim, in the MXU operand dtype.
    zht = jnp.concatenate([x, h, t], axis=1)
    zht = jnp.pad(zht, ((0, 0), (0, Kp - K))).astype(dtype)
    c_pad = jnp.pad(c, ((0, 0), (0, Hp - H))).astype(jnp.float32)

    # Batch tiling: "parallel" batch-tile axis feeds both TCs on v7x.
    bm = 128 if (B % 128 == 0) else B
    grid = (B // bm,)

    cost = pl.CostEstimate(
        flops=2 * B * Kp * 8 * Hp + 30 * B * Hp,
        transcendentals=8 * B * Hp,
        bytes_accessed=(zht.size * zht.dtype.itemsize
                        + c_pad.size * 4
                        + fused["w"].size * fused["w"].dtype.itemsize
                        + fused["b"].size * 4
                        + fused["peep"].size * 4
                        + B * 2 * Hp * 4),
    )

    out = pl.pallas_call(
        tlstm3_kernel,
        out_shape=jax.ShapeDtypeStruct((B, 2 * Hp), jnp.float32),
        grid_spec=pltpu.PrefetchScalarGridSpec(
            num_scalar_prefetch=0,
            grid=grid,
            in_specs=[
                pl.BlockSpec((bm, Kp), lambda i: (i, 0)),
                pl.BlockSpec((bm, Hp), lambda i: (i, 0)),
                # Weights / bias / peepholes: constant block -> DMA'd once,
                # VMEM-resident across all grid steps.
                pl.BlockSpec((Kp, 8 * Hp), lambda i: (0, 0)),
                pl.BlockSpec((1, 8 * Hp), lambda i: (0, 0)),
                pl.BlockSpec((8, Hp), lambda i: (0, 0)),
            ],
            out_specs=pl.BlockSpec((bm, 2 * Hp), lambda i: (i, 0)),
        ),
        compiler_params=pltpu.CompilerParams(
            dimension_semantics=("parallel",),
            vmem_limit_bytes=32 * 1024 * 1024,
        ),
        cost_estimate=cost,
    )(zht, c_pad, fused["w"], fused["b"], fused["peep"])

    return out[:, :H], out[:, Hp:Hp + H]


def make_params(key, input_dim, hidden_dim):
    """Deterministic init matching TLSTM3_Unit.__init__ shapes.

    Weights stored (in, out) so the math is x @ W + b (== nn.Linear).
    W_t1 is clamped to <= 0 as in the reference.  Peepholes get small random
    values (PyTorch inits them to zero) so that path is exercised.
    """
    keys = jax.random.split(key, 16)
    H, D = hidden_dim, input_dim

    def lin(k, fan_in, fan_out):
        bound = 1.0 / jnp.sqrt(fan_in)
        kw, kb = jax.random.split(k)
        w = jax.random.uniform(kw, (fan_in, fan_out), jnp.float32, -bound, bound)
        b = jax.random.uniform(kb, (1, fan_out), jnp.float32, -bound, bound)
        return w, b

    w_all, b_all = lin(keys[0], D, 3 * H)
    u_all, bu_all = lin(keys[1], H, 3 * H)
    w_t1, b_t1 = lin(keys[2], 1, H)
    w_t1 = jnp.minimum(w_t1, 0.0)  # torch.clamp(..., max=0.0)
    w_x1, b_x1 = lin(keys[3], D, H)
    w_t2, b_t2 = lin(keys[4], 1, H)
    w_x2, b_x2 = lin(keys[5], D, H)
    w_to, b_to = lin(keys[6], 1, H)
    w_ci = 0.1 * jax.random.normal(keys[7], (1, H), jnp.float32)
    w_co = 0.1 * jax.random.normal(keys[8], (1, H), jnp.float32)

    return {
        "w_all": w_all, "b_all": b_all, "u_all": u_all, "bu_all": bu_all,
        "w_t1": w_t1, "b_t1": b_t1, "w_x1": w_x1, "b_x1": b_x1,
        "w_t2": w_t2, "b_t2": b_t2, "w_x2": w_x2, "b_x2": b_x2,
        "w_to": w_to, "b_to": b_to,
        "w_ci": w_ci, "w_co": w_co,
    }


def tlstm3_reference(h, c, x, t, p):
    """Pure-JAX f32 reference mirroring the PyTorch forward, for validation."""
    H = h.shape[1]
    sig, tanh = jax.nn.sigmoid, jnp.tanh
    T1 = sig(tanh(t @ p["w_t1"] + p["b_t1"]) + x @ p["w_x1"] + p["b_x1"])
    T2 = sig(tanh(t @ p["w_t2"] + p["b_t2"]) + x @ p["w_x2"] + p["b_x2"])
    outs = x @ p["w_all"] + p["b_all"] + h @ p["u_all"] + p["bu_all"]
    i, o, c_tmp = outs[:, :H], outs[:, H:2 * H], outs[:, 2 * H:]
    i = sig(i + c * p["w_ci"])
    c_tmp = tanh(c_tmp)
    cell = (1 - i) * c + i * T2 * c_tmp
    c_tilde = (1 - i * T1) * c + i * T1 * c_tmp
    o = sig(o + c_tilde * p["w_co"] + t @ p["w_to"] + p["b_to"])
    new_h = o * tanh(cell)
    return new_h, c_tilde


if __name__ == "__main__":
    B, D, H = 8, 16, 32  # batch, input_dim, hidden_dim

    key = jax.random.PRNGKey(0)
    k_h, k_c, k_x, k_t, k_p = jax.random.split(key, 5)
    h = jax.random.normal(k_h, (B, H), jnp.float32)
    c = jax.random.normal(k_c, (B, H), jnp.float32)
    x = jax.random.normal(k_x, (B, D), jnp.float32)
    t = jax.random.uniform(k_t, (B, 1), jnp.float32)
    params = make_params(k_p, D, H)

    ref_h, ref_ct = tlstm3_reference(h, c, x, t, params)

    # f32 MXU operands: tight check against the pure-JAX reference.
    fused_f32 = fuse_params(params, D, H, matmul_dtype=jnp.float32)
    new_h, c_tilde = tlstm3_unit(h, c, x, t, fused_f32)
    jax.block_until_ready((new_h, c_tilde))
    assert jnp.allclose(new_h, ref_h, atol=1e-5, rtol=1e-5)
    assert jnp.allclose(c_tilde, ref_ct, atol=1e-5, rtol=1e-5)

    # bf16 MXU operands (f32 accumulate, f32 gating): fast path on v5e/v6e/v7x.
    fused_bf16 = fuse_params(params, D, H, matmul_dtype=jnp.bfloat16)
    new_h_b, c_tilde_b = tlstm3_unit(h, c, x, t, fused_bf16)
    jax.block_until_ready((new_h_b, c_tilde_b))
    assert jnp.allclose(new_h_b, ref_h, atol=3e-2, rtol=3e-2)
    assert jnp.allclose(c_tilde_b, ref_ct, atol=3e-2, rtol=3e-2)

    print("KERNEL_OK")
</pallas_src>

<mosaic_0001>
module attributes {stable_mosaic.version = 11 : i64} {
  func.func @tlstm3_kernel(%arg0: i32, %arg1: memref<8x128xf32, #tpu.memory_space<vmem>>, %arg2: memref<8x128xf32, #tpu.memory_space<vmem>>, %arg3: memref<128x1024xf32, #tpu.memory_space<vmem>>, %arg4: memref<1x1024xf32, #tpu.memory_space<vmem>>, %arg5: memref<8x128xf32, #tpu.memory_space<vmem>>, %arg6: memref<8x256xf32, #tpu.memory_space<vmem>>) attributes {dimension_semantics = [#tpu.dimension_semantics<parallel>], iteration_bounds = array<i64: 1>, scalar_prefetch = 0 : i64, scratch_operands = 0 : i64, tpu.core_type = #tpu.core_type<tc>, window_params = [{transform_indices = @transform_0, window_bounds = array<i64: 8, 128>}, {transform_indices = @transform_1, window_bounds = array<i64: 8, 128>}, {pipeline_mode = #tpu.pipeline_mode<synchronous>, transform_indices = @transform_2, window_bounds = array<i64: 128, 1024>}, {pipeline_mode = #tpu.pipeline_mode<synchronous>, transform_indices = @transform_3, window_bounds = array<i64: 1, 1024>}, {pipeline_mode = #tpu.pipeline_mode<synchronous>, transform_indices = @transform_4, window_bounds = array<i64: 8, 128>}, {transform_indices = @transform_5, window_bounds = array<i64: 8, 256>}]} {
    %c0 = arith.constant 0 : index
    %c0_0 = arith.constant 0 : index
    %0 = vector.load %arg2[%c0, %c0_0] : memref<8x128xf32, #tpu.memory_space<vmem>>, vector<8x128xf32>
    %c0_1 = arith.constant 0 : index
    %c0_2 = arith.constant 0 : index
    %1 = vector.load %arg1[%c0_1, %c0_2] : memref<8x128xf32, #tpu.memory_space<vmem>>, vector<8x128xf32>
    %c0_3 = arith.constant 0 : index
    %c0_4 = arith.constant 0 : index
    %2 = vector.load %arg3[%c0_3, %c0_4] : memref<128x1024xf32, #tpu.memory_space<vmem>>, vector<128x1024xf32>
    %cst = arith.constant dense<0.000000e+00> : vector<8x1024xf32>
    %3 = tpu.matmul %1, %2, %cst {dimension_numbers = #tpu.dot_dimension_numbers<[1], [0], [0], [1], [0, 0, 1, 1], [], []>} : vector<8x128xf32>, vector<128x1024xf32>, vector<8x1024xf32> -> vector<8x1024xf32>
    %c0_5 = arith.constant 0 : index
    %c0_6 = arith.constant 0 : index
    %4 = vector.load %arg4[%c0_5, %c0_6] : memref<1x1024xf32, #tpu.memory_space<vmem>>, vector<1x1024xf32>
    %5 = vector.broadcast %4 : vector<1x1024xf32> to vector<8x1024xf32>
    %6 = arith.addf %3, %5 : vector<8x1024xf32>
    %7 = vector.extract_strided_slice %6 {offsets = [0, 0], sizes = [8, 128], strides = [1, 1]} : vector<8x1024xf32> to vector<8x128xf32>
    %8 = vector.extract_strided_slice %6 {offsets = [0, 128], sizes = [8, 128], strides = [1, 1]} : vector<8x1024xf32> to vector<8x128xf32>
    %9 = vector.extract_strided_slice %6 {offsets = [0, 256], sizes = [8, 128], strides = [1, 1]} : vector<8x1024xf32> to vector<8x128xf32>
    %10 = vector.extract_strided_slice %6 {offsets = [0, 384], sizes = [8, 128], strides = [1, 1]} : vector<8x1024xf32> to vector<8x128xf32>
    %11 = vector.extract_strided_slice %6 {offsets = [0, 512], sizes = [8, 128], strides = [1, 1]} : vector<8x1024xf32> to vector<8x128xf32>
    %12 = vector.extract_strided_slice %6 {offsets = [0, 640], sizes = [8, 128], strides = [1, 1]} : vector<8x1024xf32> to vector<8x128xf32>
    %13 = vector.extract_strided_slice %6 {offsets = [0, 768], sizes = [8, 128], strides = [1, 1]} : vector<8x1024xf32> to vector<8x128xf32>
    %14 = vector.extract_strided_slice %6 {offsets = [0, 896], sizes = [8, 128], strides = [1, 1]} : vector<8x1024xf32> to vector<8x128xf32>
    %c0_7 = arith.constant 0 : index
    %c0_8 = arith.constant 0 : index
    %15 = vector.load %arg5[%c0_7, %c0_8] : memref<8x128xf32, #tpu.memory_space<vmem>>, vector<1x128xf32>
    %c1 = arith.constant 1 : index
    %c0_9 = arith.constant 0 : index
    %16 = vector.load %arg5[%c1, %c0_9] : memref<8x128xf32, #tpu.memory_space<vmem>>, vector<1x128xf32>
    %17 = math.tanh %12 : vector<8x128xf32>
    %18 = arith.addf %17, %10 : vector<8x128xf32>
    %19 = arith.negf %18 : vector<8x128xf32>
    %20 = math.exp %19 : vector<8x128xf32>
    %cst_10 = arith.constant 1.000000e+00 : f32
    %21 = vector.broadcast %cst_10 : f32 to vector<8x128xf32>
    %22 = arith.addf %21, %20 : vector<8x128xf32>
    %23 = arith.divf %21, %22 : vector<8x128xf32>
    %24 = math.tanh %13 : vector<8x128xf32>
    %25 = arith.addf %24, %11 : vector<8x128xf32>
    %26 = arith.negf %25 : vector<8x128xf32>
    %27 = math.exp %26 : vector<8x128xf32>
    %cst_11 = arith.constant 1.000000e+00 : f32
    %28 = vector.broadcast %cst_11 : f32 to vector<8x128xf32>
    %29 = arith.addf %28, %27 : vector<8x128xf32>
    %30 = arith.divf %28, %29 : vector<8x128xf32>
    %31 = vector.broadcast %15 : vector<1x128xf32> to vector<8x128xf32>
    %32 = arith.mulf %0, %31 : vector<8x128xf32>
    %33 = arith.addf %7, %32 : vector<8x128xf32>
    %34 = arith.negf %33 : vector<8x128xf32>
    %35 = math.exp %34 : vector<8x128xf32>
    %cst_12 = arith.constant 1.000000e+00 : f32
    %36 = vector.broadcast %cst_12 : f32 to vector<8x128xf32>
    %37 = arith.addf %36, %35 : vector<8x128xf32>
    %38 = arith.divf %36, %37 : vector<8x128xf32>
    %39 = math.tanh %9 : vector<8x128xf32>
    %cst_13 = arith.constant 1.000000e+00 : f32
    %40 = vector.broadcast %cst_13 : f32 to vector<8x128xf32>
    %41 = arith.subf %40, %38 : vector<8x128xf32>
    %42 = arith.mulf %41, %0 : vector<8x128xf32>
    %43 = arith.mulf %38, %30 : vector<8x128xf32>
    %44 = arith.mulf %43, %39 : vector<8x128xf32>
    %45 = arith.addf %42, %44 : vector<8x128xf32>
    %46 = arith.mulf %38, %23 : vector<8x128xf32>
    %cst_14 = arith.constant 1.000000e+00 : f32
    %47 = vector.broadcast %cst_14 : f32 to vector<8x128xf32>
    %48 = arith.subf %47, %46 : vector<8x128xf32>
    %49 = arith.mulf %48, %0 : vector<8x128xf32>
    %50 = arith.mulf %38, %23 : vector<8x128xf32>
    %51 = arith.mulf %50, %39 : vector<8x128xf32>
    %52 = arith.addf %49, %51 : vector<8x128xf32>
    %53 = vector.broadcast %16 : vector<1x128xf32> to vector<8x128xf32>
    %54 = arith.mulf %52, %53 : vector<8x128xf32>
    %55 = arith.addf %8, %54 : vector<8x128xf32>
    %56 = arith.addf %55, %14 : vector<8x128xf32>
    %57 = arith.negf %56 : vector<8x128xf32>
    %58 = math.exp %57 : vector<8x128xf32>
    %cst_15 = arith.constant 1.000000e+00 : f32
    %59 = vector.broadcast %cst_15 : f32 to vector<8x128xf32>
    %60 = arith.addf %59, %58 : vector<8x128xf32>
    %61 = arith.divf %59, %60 : vector<8x128xf32>
    %62 = math.tanh %45 : vector<8x128xf32>
    %63 = arith.mulf %61, %62 : vector<8x128xf32>
    %c0_16 = arith.constant 0 : index
    %c0_17 = arith.constant 0 : index
    %64 = vector.load %arg6[%c0_16, %c0_17] : memref<8x256xf32, #tpu.memory_space<vmem>>, vector<8x128xf32>
    tpu.vector_store %arg6[%c0_16, %c0_17], %63 {strides = array<i32>} : memref<8x256xf32, #tpu.memory_space<vmem>>, vector<8x128xf32>,
    %c0_18 = arith.constant 0 : index
    %c128 = arith.constant 128 : index
    %65 = vector.load %arg6[%c0_18, %c128] : memref<8x256xf32, #tpu.memory_space<vmem>>, vector<8x128xf32>
    tpu.vector_store %arg6[%c0_18, %c128], %52 {strides = array<i32>} : memref<8x256xf32, #tpu.memory_space<vmem>>, vector<8x128xf32>,
    return
  }
  func.func @transform_0(%arg0: i32) -> (i32, i32) {
    %c0_i32 = arith.constant 0 : i32
    %c0_i32_0 = arith.constant 0 : i32
    return %arg0, %c0_i32 : i32, i32
  }
  func.func @transform_1(%arg0: i32) -> (i32, i32) {
    %c0_i32 = arith.constant 0 : i32
    %c0_i32_0 = arith.constant 0 : i32
    return %arg0, %c0_i32 : i32, i32
  }
  func.func @transform_2(%arg0: i32) -> (i32, i32) {
    %c0_i32 = arith.constant 0 : i32
    %c0_i32_0 = arith.constant 0 : i32
    %c0_i32_1 = arith.constant 0 : i32
    return %c0_i32, %c0_i32_0 : i32, i32
  }
  func.func @transform_3(%arg0: i32) -> (i32, i32) {
    %c0_i32 = arith.constant 0 : i32
    %c0_i32_0 = arith.constant 0 : i32
    %c0_i32_1 = arith.constant 0 : i32
    return %c0_i32, %c0_i32_0 : i32, i32
  }
  func.func @transform_4(%arg0: i32) -> (i32, i32) {
    %c0_i32 = arith.constant 0 : i32
    %c0_i32_0 = arith.constant 0 : i32
    %c0_i32_1 = arith.constant 0 : i32
    return %c0_i32, %c0_i32_0 : i32, i32
  }
  func.func @transform_5(%arg0: i32) -> (i32, i32) {
    %c0_i32 = arith.constant 0 : i32
    %c0_i32_0 = arith.constant 0 : i32
    return %arg0, %c0_i32 : i32, i32
  }
}

</mosaic_0001>

<bundles_post_ra>
// kernel: tpu_custom_call.1
= control target key start
LH: loop header
LB: loop body
LE: loop exit
PB: predicated region body
PF: predicated region fallthrough
CT: control target
= control target key end

     0   :  { %10 = vsyncpa [#allocation3], 0  ;;  %s1019_s0 = inlined_call_operand.hbm [shape: f32[8,128], index: 0, kind: input, shape index: {}]   ;;  %s1020_s1 = inlined_call_operand.hbm [shape: f32[8,128], index: 1, kind: input, shape index: {}]   ;;  %s1021_s2 = inlined_call_operand.hbm [shape: f32[128,1024], index: 2, kind: input, shape index: {}]   ;;  %s1022_s3 = inlined_call_operand.vmem [shape: f32[1,1024], index: 3, kind: input, shape index: {}]   ;;  %s1023_s4 = inlined_call_operand.hbm [shape: f32[8,128], index: 4, kind: input, shape index: {}]   ;;  %s1024_s5 = inlined_call_operand.hbm [shape: f32[8,256], index: 5, kind: output, shape index: {}]  }
   0x1   :  { %11 = vsyncpa [#allocation6], 0 }
   0x2   :  { %12 = vsyncpa [#allocation9], 0 }
   0x3   :  { %13 = vsyncpa [#allocation4], 0  ;;  %s885_s18 = smov [#allocation5]   ;;  %s886_s20 = smov [#allocation2]  }
   0x4   :  { %s30_s19 = sshll.u32 %s885_s18, 4  ;;  %s20_s21 = sshll.u32 %s886_s20, 4  ;;  %s31_s19 = int_to_ptr.vmem [resolvable:$true] %s30_s19  ;;  %s21_s21 = int_to_ptr.vmem [resolvable:$true] %s20_s21 }
   0x5   :  { %s767_s24 = scalar_lea.hbm %s1020_s1, 128 }
   0x6   :  { %p768_p0 = scmp.ne.s32.totalorder %s1020_s1, %s767_s24  ;;  %p771_p1 = scmp.lt.u32.totalorder %s767_s24, %s1020_s1 }
   0x8   :  { %p773_p2 = pnand %p771_p1, %p768_p0 }
   0xa   :  { %776 = shalt.err (!%p773_p2)
}
   0xb   :  { %s777_s29 = scalar_lea.vmem %s31_s19, 128  ;;  %p782_p4 = scmp.lt.s32.totalorder %s31_s19, %s31_s19 }
   0xc   :  { %p778_p3 = scmp.ne.s32.totalorder %s31_s19, %s777_s29  ;;  %p783_p5 = scmp.lt.s32.totalorder %s777_s29, %s777_s29 }
   0xe   :  { %p784_p6 = por %p783_p5, %p782_p4 }
  0x10   :  { %p785_p7 = pnand %p784_p6, %p778_p3 }
  0x12   :  { %788 = shalt.err (!%p785_p7)
}
  0x13   :  { %33 = dma.hbm_to_vmem [thread:$0]  %s1020_s1, 128, %s31_s19, [#allocation6]  }
  0x14   :  { %s789_s9 = scalar_lea.hbm %s1019_s0, 128 }
  0x15   :  { %p790_p8 = scmp.ne.s32.totalorder %s1019_s0, %s789_s9  ;;  %p793_p9 = scmp.lt.u32.totalorder %s789_s9, %s1019_s0 }
  0x17   :  { %p795_p10 = pnand %p793_p9, %p790_p8 }
  0x19   :  { %798 = shalt.err (!%p795_p10)
}
  0x1a   :  { %s799_s14 = scalar_lea.vmem %s21_s21, 128  ;;  %p804_p12 = scmp.lt.s32.totalorder %s21_s21, %s21_s21 }
  0x1b   :  { %p800_p11 = scmp.ne.s32.totalorder %s21_s21, %s799_s14  ;;  %p805_p13 = scmp.lt.s32.totalorder %s799_s14, %s799_s14 }
  0x1d   :  { %p806_p0 = por %p805_p13, %p804_p12 }
  0x1f   :  { %p807_p1 = pnand %p806_p0, %p800_p11 }
  0x21   :  { %810 = shalt.err (!%p807_p1)
}
  0x22   :  { %23 = dma.hbm_to_vmem [thread:$0]  %s1019_s0, 128, %s21_s21, [#allocation3]  }
  0x23   :  { %s887_s16 = smov [#allocation7]   ;;  %s811_s20 = scalar_lea.hbm %s1021_s2, 16384 }
  0x24   :  { %s39_s17 = sshll.u32 %s887_s16, 4  ;;  %p812_p2 = scmp.ne.s32.totalorder %s1021_s2, %s811_s20  ;;  %s40_s17 = int_to_ptr.vmem [resolvable:$true] %s39_s17 }
  0x25   :  { %p815_p3 = scmp.lt.u32.totalorder %s811_s20, %s1021_s2 }
  0x27   :  { %p817_p4 = pnand %p815_p3, %p812_p2 }
  0x29   :  { %820 = shalt.err (!%p817_p4)
}
  0x2a   :  { %s821_s26 = scalar_lea.vmem %s40_s17, 16384  ;;  %p826_p6 = scmp.lt.s32.totalorder %s40_s17, %s40_s17 }
  0x2b   :  { %p822_p5 = scmp.ne.s32.totalorder %s40_s17, %s821_s26  ;;  %p827_p7 = scmp.lt.s32.totalorder %s821_s26, %s821_s26 }
  0x2d   :  { %p828_p8 = por %p827_p7, %p826_p6 }
  0x2f   :  { %p829_p9 = pnand %p828_p8, %p822_p5 }
  0x31   :  { %832 = shalt.err (!%p829_p9)
}
  0x32   :  { %s888_s0 = smov 1024   ;;  %s889_s21 = smov 64  }
  0x33   :  { %45 = dma.hbm_to_vmem [thread:$0]  %s1021_s2, 16384, %s40_s17, [#allocation6], %s888_s0, %s888_s0, %s889_s21  }
  0x34   :  { %s890_s29 = smov [#allocation8]   ;;  %s833_s8 = scalar_lea.hbm %s1023_s4, 128 }
  0x35   :  { %s54_s30 = sshll.u32 %s890_s29, 4  ;;  %p834_p10 = scmp.ne.s32.totalorder %s1023_s4, %s833_s8  ;;  %s55_s30 = int_to_ptr.vmem [resolvable:$true] %s54_s30 }
  0x36   :  { %p837_p11 = scmp.lt.u32.totalorder %s833_s8, %s1023_s4 }
  0x38   :  { %p839_p12 = pnand %p837_p11, %p834_p10 }
  0x3a   :  { %842 = shalt.err (!%p839_p12)
}
  0x3b   :  { %s843_s13 = scalar_lea.vmem %s55_s30, 128  ;;  %p848_p0 = scmp.lt.s32.totalorder %s55_s30, %s55_s30 }
  0x3c   :  { %p844_p13 = scmp.ne.s32.totalorder %s55_s30, %s843_s13  ;;  %p849_p1 = scmp.lt.s32.totalorder %s843_s13, %s843_s13 }
  0x3e   :  { %p850_p2 = por %p849_p1, %p848_p0 }
  0x40   :  { %p851_p3 = pnand %p850_p2, %p844_p13 }
  0x42   :  { %854 = shalt.err (!%p851_p3)
}
  0x43   :  { %57 = dma.hbm_to_vmem [thread:$0]  %s1023_s4, 128, %s55_s30, [#allocation9]  }
  0x44   :  { %877 = dma.done.wait [#allocation3], 128  }
  0x45   :  { %878 = vsyncadd [#allocation3], 4294967168 }
  0x46   :  { %879 = dma.done.wait [#allocation6], 16512  }
  0x47   :  { %880 = vsyncadd [#allocation6], 4294950784 }
  0x48   :  { %881 = dma.done.wait [#allocation9], 128  }
  0x49   :  { %882 = vsyncadd [#allocation9], 4294967168  ;;  %v891_v0 = vmov 0.0   ;;  %v73_v1 = vld [vmem:[#allocation7 + $0x8] sm:$0xff]  ;;  %v75_v3 = vld [vmem:[#allocation7 + $0x18] sm:$0xff] }
  0x4a   :  { %306 = vmatprep.mubr.f32.mxu0 %v891_v0  ;;  %377 = vmatprep.mubr.f32.mxu1 %v891_v0  ;;  %v81_v2 = vld [vmem:[#allocation7 + $0x48] sm:$0xff]  ;;  %v83_v5 = vld [vmem:[#allocation7 + $0x58] sm:$0xff]  ;;  %v72_v6 = vld [vmem:[#allocation7] sm:$0xff] }
  0x4b   :  { %v607_v4 = vpack.c.bf16 %v81_v2, %v73_v1  ;;  %v80_v7 = vld [vmem:[#allocation7 + $0x40] sm:$0xff]  ;;  %v639_v8 = vpack.c.bf16 %v83_v5, %v75_v3  ;;  %v74_v10 = vld [vmem:[#allocation7 + $0x10] sm:$0xff]  ;;  %v89_v12 = vld [vmem:[#allocation7 + $0x88] sm:$0xff] }
  0x4c   :  { %v609_v9 = vpack.c.bf16 %v80_v7, %v72_v6  ;;  %v82_v11 = vld [vmem:[#allocation7 + $0x50] sm:$0xff]  ;;  %v97_v14 = vld [vmem:[#allocation7 + $0xc8] sm:$0xff]  ;;  %v91_v15 = vld [vmem:[#allocation7 + $0x98] sm:$0xff] }
  0x4d   :  { %608 = vmatprep.subr.bf16.mxu0 %v607_v4  ;;  %v641_v13 = vpack.c.bf16 %v82_v11, %v74_v10  ;;  %v99_v16 = vld [vmem:[#allocation7 + $0xd8] sm:$0xff]  ;;  %640 = vmatprep.subr.bf16.mxu1 %v639_v8  ;;  %v611_v17 = vpack.c.bf16 %v97_v14, %v89_v12  ;;  %v88_v19 = vld [vmem:[#allocation7 + $0x80] sm:$0xff]  ;;  %v90_v21 = vld [vmem:[#allocation7 + $0x90] sm:$0xff] }
  0x4e   :  { %610 = vmatpush1.bf16.msra.mxu0 %v609_v9  ;;  %v643_v18 = vpack.c.bf16 %v99_v16, %v91_v15  ;;  %v96_v20 = vld [vmem:[#allocation7 + $0xc0] sm:$0xff]  ;;  %v98_v23 = vld [vmem:[#allocation7 + $0xd0] sm:$0xff]  ;;  %v105_v24 = vld [vmem:[#allocation7 + $0x108] sm:$0xff] }
  0x4f   :  { %642 = vmatpush1.bf16.msra.mxu1 %v641_v13  ;;  %v613_v22 = vpack.c.bf16 %v96_v20, %v88_v19  ;;  %v113_v25 = vld [vmem:[#allocation7 + $0x148] sm:$0xff]  ;;  %612 = vmatprep.subr.bf16.mxu0 %v611_v17  ;;  %v645_v26 = vpack.c.bf16 %v98_v23, %v90_v21  ;;  %v107_v28 = vld [vmem:[#allocation7 + $0x118] sm:$0xff]  ;;  %v104_v30 = vld [vmem:[#allocation7 + $0x100] sm:$0xff] }
  0x50   :  { %644 = vmatprep.subr.bf16.mxu1 %v643_v18  ;;  %v615_v27 = vpack.c.bf16 %v113_v25, %v105_v24  ;;  %v115_v29 = vld [vmem:[#allocation7 + $0x158] sm:$0xff]  ;;  %v112_v32 = vld [vmem:[#allocation7 + $0x140] sm:$0xff]  ;;  %v106_v33 = vld [vmem:[#allocation7 + $0x110] sm:$0xff] }
  0x51   :  { %v647_v31 = vpack.c.bf16 %v115_v29, %v107_v28  ;;  %v114_v34 = vld [vmem:[#allocation7 + $0x150] sm:$0xff]  ;;  %v617_v35 = vpack.c.bf16 %v112_v32, %v104_v30  ;;  %v121_v36 = vld [vmem:[#allocation7 + $0x188] sm:$0xff]  ;;  %v123_v38 = vld [vmem:[#allocation7 + $0x198] sm:$0xff] }
  0x52   :  { %614 = vmatpush1.bf16.msra.mxu0 %v613_v22  ;;  %v129_v37 = vld [vmem:[#allocation7 + $0x1c8] sm:$0xff]  ;;  %v649_v39 = vpack.c.bf16 %v114_v34, %v106_v33  ;;  %v131_v41 = vld [vmem:[#allocation7 + $0x1d8] sm:$0xff]  ;;  %v120_v42 = vld [vmem:[#allocation7 + $0x180] sm:$0xff] }
  0x53   :  { %646 = vmatpush1.bf16.msra.mxu1 %v645_v26  ;;  %616 = vmatprep.subr.bf16.mxu0 %v615_v27  ;;  %v619_v40 = vpack.c.bf16 %v129_v37, %v121_v36  ;;  %v128_v43 = vld [vmem:[#allocation7 + $0x1c0] sm:$0xff]  ;;  %v651_v44 = vpack.c.bf16 %v131_v41, %v123_v38  ;;  %v122_v45 = vld [vmem:[#allocation7 + $0x190] sm:$0xff]  ;;  %v137_v47 = vld [vmem:[#allocation7 + $0x208] sm:$0xff] }
  0x54   :  { %648 = vmatprep.subr.bf16.mxu1 %v647_v31  ;;  %v130_v46 = vld [vmem:[#allocation7 + $0x1d0] sm:$0xff]  ;;  %v145_v48 = vld [vmem:[#allocation7 + $0x248] sm:$0xff]  ;;  %v139_v49 = vld [vmem:[#allocation7 + $0x218] sm:$0xff]  ;;  %v621_v51 = vpack.c.bf16 %v128_v43, %v120_v42 }
  0x55   :  { %v147_v50 = vld [vmem:[#allocation7 + $0x258] sm:$0xff]  ;;  %v653_v52 = vpack.c.bf16 %v130_v46, %v122_v45  ;;  %v623_v53 = vpack.c.bf16 %v145_v48, %v137_v47  ;;  %v136_v54 = vld [vmem:[#allocation7 + $0x200] sm:$0xff]  ;;  %v138_v56 = vld [vmem:[#allocation7 + $0x210] sm:$0xff] }
  0x56   :  { %618 = vmatpush1.bf16.msra.mxu0 %v617_v35  ;;  %v144_v55 = vld [vmem:[#allocation7 + $0x240] sm:$0xff]  ;;  %v655_v57 = vpack.c.bf16 %v147_v50, %v139_v49  ;;  %v146_v58 = vld [vmem:[#allocation7 + $0x250] sm:$0xff]  ;;  %v153_v59 = vld [vmem:[#allocation7 + $0x288] sm:$0xff] }
  0x57   :  { %650 = vmatpush1.bf16.msra.mxu1 %v649_v39  ;;  %620 = vmatprep.subr.bf16.mxu0 %v619_v40  ;;  %v161_v60 = vld [vmem:[#allocation7 + $0x2c8] sm:$0xff]  ;;  %v155_v61 = vld [vmem:[#allocation7 + $0x298] sm:$0xff]  ;;  %v625_v63 = vpack.c.bf16 %v144_v55, %v136_v54  ;;  %v657_v1 = vpack.c.bf16 %v146_v58, %v138_v56  ;;  %v152_v3 = vld [vmem:[#allocation7 + $0x280] sm:$0xff] }
  0x58   :  { %652 = vmatprep.subr.bf16.mxu1 %v651_v44  ;;  %v163_v62 = vld [vmem:[#allocation7 + $0x2d8] sm:$0xff]  ;;  %v627_v2 = vpack.c.bf16 %v161_v60, %v153_v59  ;;  %v160_v4 = vld [vmem:[#allocation7 + $0x2c0] sm:$0xff]  ;;  %v154_v5 = vld [vmem:[#allocation7 + $0x290] sm:$0xff] }
  0x59   :  { %v659_v6 = vpack.c.bf16 %v163_v62, %v155_v61  ;;  %v162_v7 = vld [vmem:[#allocation7 + $0x2d0] sm:$0xff]  ;;  %v169_v8 = vld [vmem:[#allocation7 + $0x308] sm:$0xff]  ;;  %v171_v10 = vld [vmem:[#allocation7 + $0x318] sm:$0xff]  ;;  %v629_v12 = vpack.c.bf16 %v160_v4, %v152_v3 }
  0x5a   :  { %622 = vmatpush1.bf16.msra.mxu0 %v621_v51  ;;  %v177_v9 = vld [vmem:[#allocation7 + $0x348] sm:$0xff]  ;;  %v179_v11 = vld [vmem:[#allocation7 + $0x358] sm:$0xff]  ;;  %v661_v13 = vpack.c.bf16 %v162_v7, %v154_v5  ;;  %v168_v15 = vld [vmem:[#allocation7 + $0x300] sm:$0xff] }
  0x5b   :  { %654 = vmatpush1.bf16.msra.mxu1 %v653_v52  ;;  %624 = vmatprep.subr.bf16.mxu0 %v623_v53  ;;  %v631_v14 = vpack.c.bf16 %v177_v9, %v169_v8  ;;  %v176_v16 = vld [vmem:[#allocation7 + $0x340] sm:$0xff]  ;;  %v170_v17 = vld [vmem:[#allocation7 + $0x310] sm:$0xff]  ;;  %v663_v18 = vpack.c.bf16 %v179_v11, %v171_v10  ;;  %v185_v20 = vld [vmem:[#allocation7 + $0x388] sm:$0xff] }
  0x5c   :  { %656 = vmatprep.subr.bf16.mxu1 %v655_v57  ;;  %v178_v19 = vld [vmem:[#allocation7 + $0x350] sm:$0xff]  ;;  %v193_v21 = vld [vmem:[#allocation7 + $0x3c8] sm:$0xff]  ;;  %v187_v22 = vld [vmem:[#allocation7 + $0x398] sm:$0xff]  ;;  %v633_v24 = vpack.c.bf16 %v176_v16, %v168_v15 }
  0x5d   :  { %v195_v23 = vld [vmem:[#allocation7 + $0x3d8] sm:$0xff]  ;;  %v665_v25 = vpack.c.bf16 %v178_v19, %v170_v17  ;;  %v635_v26 = vpack.c.bf16 %v193_v21, %v185_v20  ;;  %v184_v27 = vld [vmem:[#allocation7 + $0x380] sm:$0xff]  ;;  %v186_v29 = vld [vmem:[#allocation7 + $0x390] sm:$0xff] }
  0x5e   :  { %626 = vmatpush1.bf16.msra.mxu0 %v625_v63  ;;  %v192_v28 = vld [vmem:[#allocation7 + $0x3c0] sm:$0xff]  ;;  %v667_v30 = vpack.c.bf16 %v195_v23, %v187_v22  ;;  %v194_v31 = vld [vmem:[#allocation7 + $0x3d0] sm:$0xff]  ;;  %v77_v32 = vld [vmem:[#allocation7 + $0x28] sm:$0xff] }
  0x5f   :  { %658 = vmatpush1.bf16.msra.mxu1 %v657_v1  ;;  %628 = vmatprep.subr.bf16.mxu0 %v627_v2  ;;  %v85_v33 = vld [vmem:[#allocation7 + $0x68] sm:$0xff]  ;;  %v79_v34 = vld [vmem:[#allocation7 + $0x38] sm:$0xff]  ;;  %v637_v36 = vpack.c.bf16 %v192_v28, %v184_v27  ;;  %v669_v37 = vpack.c.bf16 %v194_v31, %v186_v29  ;;  %v76_v39 = vld [vmem:[#allocation7 + $0x20] sm:$0xff] }
  0x60   :  { %660 = vmatprep.subr.bf16.mxu1 %v659_v6  ;;  %v87_v35 = vld [vmem:[#allocation7 + $0x78] sm:$0xff]  ;;  %v671_v38 = vpack.c.bf16 %v85_v33, %v77_v32  ;;  %v84_v40 = vld [vmem:[#allocation7 + $0x60] sm:$0xff]  ;;  %v78_v41 = vld [vmem:[#allocation7 + $0x30] sm:$0xff] }
  0x61   :  { %v703_v42 = vpack.c.bf16 %v87_v35, %v79_v34  ;;  %v86_v43 = vld [vmem:[#allocation7 + $0x70] sm:$0xff]  ;;  %v93_v44 = vld [vmem:[#allocation7 + $0xa8] sm:$0xff]  ;;  %v95_v46 = vld [vmem:[#allocation7 + $0xb8] sm:$0xff]  ;;  %v673_v49 = vpack.c.bf16 %v84_v40, %v76_v39 }
  0x62   :  { %630 = vmatpush1.bf16.msra.mxu0 %v629_v12  ;;  %v101_v45 = vld [vmem:[#allocation7 + $0xe8] sm:$0xff]  ;;  %v103_v47 = vld [vmem:[#allocation7 + $0xf8] sm:$0xff]  ;;  %v973_v48 = vld [vmem:[#allocation2] sm:$0xff]  ;;  %v705_v50 = vpack.c.bf16 %v86_v43, %v78_v41 }
  0x63   :  { %662 = vmatpush1.bf16.msra.mxu1 %v661_v13  ;;  %632 = vmatprep.subr.bf16.mxu0 %v631_v14  ;;  %v675_v51 = vpack.c.bf16 %v101_v45, %v93_v44  ;;  %v92_v52 = vld [vmem:[#allocation7 + $0xa0] sm:$0xff]  ;;  %v94_v54 = vld [vmem:[#allocation7 + $0xb0] sm:$0xff]  ;;  %v707_v55 = vpack.c.bf16 %v103_v47, %v95_v46  ;;  %v109_v57 = vld [vmem:[#allocation7 + $0x128] sm:$0xff] }
  0x64   :  { %664 = vmatprep.subr.bf16.mxu1 %v663_v18  ;;  %v100_v53 = vld [vmem:[#allocation7 + $0xe0] sm:$0xff]  ;;  %v102_v56 = vld [vmem:[#allocation7 + $0xf0] sm:$0xff]  ;;  %v117_v58 = vld [vmem:[#allocation7 + $0x168] sm:$0xff] }
  0x65   :  { %v111_v59 = vld [vmem:[#allocation7 + $0x138] sm:$0xff]  ;;  %v677_v61 = vpack.c.bf16 %v100_v53, %v92_v52  ;;  %v709_v62 = vpack.c.bf16 %v102_v56, %v94_v54  ;;  %v679_v63 = vpack.c.bf16 %v117_v58, %v109_v57  ;;  %v108_v1 = vld [vmem:[#allocation7 + $0x120] sm:$0xff]  ;;  %v110_v3 = vld [vmem:[#allocation7 + $0x130] sm:$0xff] }
  0x66   :  { %634 = vmatpush1.bf16.msra.mxu0 %v633_v24  ;;  %v119_v60 = vld [vmem:[#allocation7 + $0x178] sm:$0xff]  ;;  %v116_v2 = vld [vmem:[#allocation7 + $0x160] sm:$0xff]  ;;  %v118_v5 = vld [vmem:[#allocation7 + $0x170] sm:$0xff] }
  0x67   :  { %666 = vmatpush1.bf16.msra.mxu1 %v665_v25  ;;  %636 = vmatprep.subr.bf16.mxu0 %v635_v26  ;;  %v711_v4 = vpack.c.bf16 %v119_v60, %v111_v59  ;;  %v125_v6 = vld [vmem:[#allocation7 + $0x1a8] sm:$0xff]  ;;  %v127_v8 = vld [vmem:[#allocation7 + $0x1b8] sm:$0xff]  ;;  %v681_v10 = vpack.c.bf16 %v116_v2, %v108_v1  ;;  %v713_v11 = vpack.c.bf16 %v118_v5, %v110_v3  ;;  %v124_v13 = vld [vmem:[#allocation7 + $0x1a0] sm:$0xff] }
  0x68   :  { %668 = vmatprep.subr.bf16.mxu1 %v667_v30  ;;  %v133_v7 = vld [vmem:[#allocation7 + $0x1e8] sm:$0xff]  ;;  %v135_v9 = vld [vmem:[#allocation7 + $0x1f8] sm:$0xff]  ;;  %v132_v14 = vld [vmem:[#allocation7 + $0x1e0] sm:$0xff] }
  0x69   :  { %v683_v12 = vpack.c.bf16 %v133_v7, %v125_v6  ;;  %v126_v15 = vld [vmem:[#allocation7 + $0x1b0] sm:$0xff]  ;;  %v715_v16 = vpack.c.bf16 %v135_v9, %v127_v8  ;;  %v141_v18 = vld [vmem:[#allocation7 + $0x228] sm:$0xff]  ;;  %v143_v20 = vld [vmem:[#allocation7 + $0x238] sm:$0xff]  ;;  %v685_v22 = vpack.c.bf16 %v132_v14, %v124_v13  ;;  %v202_v9 = vlaneseq }
  0x6a   :  { %638 = vmatpush1.bf16.msra.mxu0 %v637_v36  ;;  %v134_v17 = vld [vmem:[#allocation7 + $0x1f0] sm:$0xff]  ;;  %v149_v19 = vld [vmem:[#allocation7 + $0x268] sm:$0xff]  ;;  %v151_v21 = vld [vmem:[#allocation7 + $0x278] sm:$0xff] }
  0x6b   :  { %670 = vmatpush1.bf16.msra.mxu1 %v669_v37  ;;  %672 = vmatprep.subr.bf16.mxu0 %v671_v38  ;;  %v687_v23 = vpack.c.bf16 %v149_v19, %v141_v18  ;;  %v140_v24 = vld [vmem:[#allocation7 + $0x220] sm:$0xff]  ;;  %v142_v26 = vld [vmem:[#allocation7 + $0x230] sm:$0xff]  ;;  %v719_v27 = vpack.c.bf16 %v151_v21, %v143_v20  ;;  %v157_v29 = vld [vmem:[#allocation7 + $0x2a8] sm:$0xff] }
  0x6c   :  { %704 = vmatprep.subr.bf16.mxu1 %v703_v42  ;;  %v148_v25 = vld [vmem:[#allocation7 + $0x260] sm:$0xff]  ;;  %v150_v28 = vld [vmem:[#allocation7 + $0x270] sm:$0xff]  ;;  %v165_v30 = vld [vmem:[#allocation7 + $0x2e8] sm:$0xff] }
  0x6d   :  { %307 = vmatmul.mubr.f32.vlgmr.msra.gmra.mrb[0].mxu0 %v973_v48  ;;  %v159_v31 = vld [vmem:[#allocation7 + $0x2b8] sm:$0xff]  ;;  %v689_v33 = vpack.c.bf16 %v148_v25, %v140_v24  ;;  %v721_v34 = vpack.c.bf16 %v150_v28, %v142_v26  ;;  %v691_v35 = vpack.c.bf16 %v165_v30, %v157_v29  ;;  %v156_v36 = vld [vmem:[#allocation7 + $0x2a0] sm:$0xff]  ;;  %v158_v38 = vld [vmem:[#allocation7 + $0x2b0] sm:$0xff] }
  0x6e   :  { %378 = vmatmul.mubr.f32.vlgmr.msra.gmra.mrb[0].mxu1 %v973_v48  ;;  %674 = vmatpush1.bf16.msra.mxu0 %v673_v49  ;;  %v167_v32 = vld [vmem:[#allocation7 + $0x2f8] sm:$0xff]  ;;  %v164_v37 = vld [vmem:[#allocation7 + $0x2e0] sm:$0xff]  ;;  %v166_v40 = vld [vmem:[#allocation7 + $0x2f0] sm:$0xff] }
  0x6f   :  { %706 = vmatpush1.bf16.msra.mxu1 %v705_v50  ;;  %676 = vmatprep.subr.bf16.mxu0 %v675_v51  ;;  %v723_v39 = vpack.c.bf16 %v167_v32, %v159_v31  ;;  %v173_v41 = vld [vmem:[#allocation7 + $0x328] sm:$0xff]  ;;  %v175_v43 = vld [vmem:[#allocation7 + $0x338] sm:$0xff]  ;;  %v693_v45 = vpack.c.bf16 %v164_v37, %v156_v36  ;;  %v725_v46 = vpack.c.bf16 %v166_v40, %v158_v38  ;;  %v172_v49 = vld [vmem:[#allocation7 + $0x320] sm:$0xff] }
  0x70   :  { %708 = vmatprep.subr.bf16.mxu1 %v707_v55  ;;  %448 = vmatprep.mubr.f32.mxu0 %v891_v0  ;;  %v181_v42 = vld [vmem:[#allocation7 + $0x368] sm:$0xff]  ;;  %v183_v44 = vld [vmem:[#allocation7 + $0x378] sm:$0xff]  ;;  %v180_v50 = vld [vmem:[#allocation7 + $0x360] sm:$0xff] }
  0x71   :  { %519 = vmatprep.mubr.f32.mxu1 %v891_v0  ;;  %v717_v0 = vpack.c.bf16 %v134_v17, %v126_v15  ;;  %v695_v47 = vpack.c.bf16 %v181_v42, %v173_v41  ;;  %v174_v51 = vld [vmem:[#allocation7 + $0x330] sm:$0xff]  ;;  %v727_v52 = vpack.c.bf16 %v183_v44, %v175_v43  ;;  %v189_v54 = vld [vmem:[#allocation7 + $0x3a8] sm:$0xff]  ;;  %v191_v56 = vld [vmem:[#allocation7 + $0x3b8] sm:$0xff]  ;;  %v697_v58 = vpack.c.bf16 %v180_v50, %v172_v49 }
  0x72   :  { %678 = vmatpush1.bf16.msra.mxu0 %v677_v61  ;;  %v182_v53 = vld [vmem:[#allocation7 + $0x370] sm:$0xff]  ;;  %v197_v55 = vld [vmem:[#allocation7 + $0x3e8] sm:$0xff]  ;;  %v199_v57 = vld [vmem:[#allocation7 + $0x3f8] sm:$0xff] }
  0x73   :  { %710 = vmatpush1.bf16.msra.mxu1 %v709_v62  ;;  %680 = vmatprep.subr.bf16.mxu0 %v679_v63  ;;  %v729_v59 = vpack.c.bf16 %v182_v53, %v174_v51  ;;  %v699_v60 = vpack.c.bf16 %v197_v55, %v189_v54  ;;  %v188_v61 = vld [vmem:[#allocation7 + $0x3a0] sm:$0xff]  ;;  %v731_v63 = vpack.c.bf16 %v199_v57, %v191_v56  ;;  %v190_v1 = vld [vmem:[#allocation7 + $0x3b0] sm:$0xff]  ;;  %v70_v15 = vld [vmem:[#allocation5] sm:$0xff] }
  0x74   :  { %712 = vmatprep.subr.bf16.mxu1 %v711_v4  ;;  %v196_v62 = vld [vmem:[#allocation7 + $0x3e0] sm:$0xff]  ;;  %v198_v2 = vld [vmem:[#allocation7 + $0x3f0] sm:$0xff] }
  0x75   :  { %v701_v3 = vpack.c.bf16 %v196_v62, %v188_v61  ;;  %v733_v4 = vpack.c.bf16 %v198_v2, %v190_v1 }
  0x76   :  { %682 = vmatpush1.bf16.msra.mxu0 %v681_v10  ;;  %v983_v10 = vshrl.u32 %v202_v9, 7 }
  0x77   :  { %714 = vmatpush1.bf16.msra.mxu1 %v713_v11  ;;  %684 = vmatprep.subr.bf16.mxu0 %v683_v12  ;;  %v989_v12 = vld [vmem:[%s1022_s3] sm:$0xff]  ;;  %s892_s3 = smov [#allocation10]  }
  0x78   :  { %716 = vmatprep.subr.bf16.mxu1 %v715_v16  ;;  %v204_v11 = vsub.s32 0, %v983_v10  ;;  %v228_v13 = vsub.s32 6, %v983_v10  ;;  %v224_v14 = vsub.s32 5, %v983_v10  ;;  %v603_v16 = vld [vmem:[#allocation8] ss:$0 sm:$0xff]  ;;  %v216_v28 = vsub.s32 3, %v983_v10 }
  0x79   :  { %v548_v20 = vmul.f32 %v603_v16, %v70_v15  ;;  %v212_v41 = vsub.s32 2, %v983_v10  ;;  %v208_v56 = vsub.s32 1, %v983_v10  ;;  %s590_s15 = sshll.u32 %s892_s3, 4  ;;  %s591_s15 = int_to_ptr.vmem [resolvable:$true] %s590_s15 }
  0x7a   :  { %686 = vmatpush1.bf16.msra.mxu0 %v685_v22  ;;  %v229_v17 = vrot.slane %v989_v12, %v228_v13  ;;  %v225_v18 = vrot.slane %v989_v12, %v224_v14  ;;  %v217_v31 = vrot.slane %v989_v12, %v216_v28  ;;  %s855_s16 = scalar_lea.vmem %s591_s15, 256  ;;  %p860_p5 = scmp.lt.s32.totalorder %s591_s15, %s591_s15 }
  0x7b   :  { %718 = vmatpush1.bf16.msra.mxu1 %v717_v0  ;;  %688 = vmatprep.subr.bf16.mxu0 %v687_v23  ;;  %v213_v43 = vrot.slane %v989_v12, %v212_v41  ;;  %v209_v1 = vrot.slane %v989_v12, %v208_v56  ;;  %p856_p4 = scmp.ne.s32.totalorder %s591_s15, %s855_s16  ;;  %p861_p6 = scmp.lt.s32.totalorder %s855_s16, %s855_s16 }
  0x7c   :  { %720 = vmatprep.subr.bf16.mxu1 %v719_v27  ;;  %v220_v27 = vsub.s32 4, %v983_v10 }
  0x7d   :  { %p862_p7 = por %p861_p6, %p860_p5 }
  0x7e   :  { %690 = vmatpush1.bf16.msra.mxu0 %v689_v33  ;;  %v221_v30 = vrot.slane %v989_v12, %v220_v27 }
  0x7f   :  { %722 = vmatpush1.bf16.msra.mxu1 %v721_v34  ;;  %692 = vmatprep.subr.bf16.mxu0 %v691_v35  ;;  %p863_p8 = pnand %p862_p7, %p856_p4 }
  0x80   :  { %724 = vmatprep.subr.bf16.mxu1 %v723_v39 }
  0x82   :  { %694 = vmatpush1.bf16.msra.mxu0 %v693_v45 }
  0x83   :  { %726 = vmatpush1.bf16.msra.mxu1 %v725_v46  ;;  %696 = vmatprep.subr.bf16.mxu0 %v695_v47 }
  0x84   :  { %728 = vmatprep.subr.bf16.mxu1 %v727_v52 }
  0x86   :  { %698 = vmatpush1.bf16.msra.mxu0 %v697_v58 }
  0x87   :  { %730 = vmatpush1.bf16.msra.mxu1 %v729_v59  ;;  %700 = vmatprep.subr.bf16.mxu0 %v699_v60  ;;  %v232_v60 = vsub.s32 7, %v983_v10 }
  0x88   :  { %732 = vmatprep.subr.bf16.mxu1 %v731_v63 }
  0x8a   :  { %702 = vmatpush1.bf16.msra.mxu0 %v701_v3  ;;  %v605_v3 = vld [vmem:[#allocation8 + $0x1] ss:$0 sm:$0xff] }
  0x8b   :  { %734 = vmatpush1.bf16.msra.mxu1 %v733_v4  ;;  %v233_v4 = vrot.slane %v989_v12, %v232_v60 }
  0x8d   :  { %449 = vmatmul.mubr.f32.vlgmr.msra.gmra.mrb[2].mxu0 %v973_v48 }
  0x8e   :  { %520 = vmatmul.mubr.f32.vlgmr.msra.gmra.mrb[2].mxu1 %v973_v48  ;;  %v205_v48 = vrot.slane %v989_v12, %v204_v11 }
 0x140   :  { %v308_v5 = vpop.f32.mrb[0].mxu0 }
 0x141   :  { %v981_v6 = vpop.f32.mrb[1].mxu0  ;;  %v379_v7 = vpop.f32.mrb[0].mxu1  ;;  %v309_v19 = vadd.f32 %v308_v5, %v205_v48 }
 0x142   :  { %v381_v8 = vpop.f32.mrb[1].mxu1  ;;  %v380_v46 = vadd.f32 %v379_v7, %v213_v43  ;;  %v311_v7 = vadd.f32 %v981_v6, %v209_v1 }
 0x143   :  { %v549_v26 = vadd.f32 %v548_v20, %v309_v19  ;;  %v382_v34 = vadd.f32 %v381_v8, %v217_v31 }
 0x145   :  { %v604_v29 = vmul.f32 -1.442695, %v549_v26 }
 0x160   :  { %v450_v21 = vpop.f32.mrb[2].mxu0 }
 0x161   :  { %v521_v22 = vpop.f32.mrb[2].mxu1  ;;  %v452_v0 = vpop.f32.mrb[3].mxu0  ;;  %v451_v32 = vadd.f32 %v450_v21, %v221_v30 }
 0x162   :  { %v522_v23 = vadd.f32 %v521_v22, %v229_v17  ;;  %v453_v24 = vadd.f32 %v452_v0, %v225_v18  ;;  %v523_v25 = vpop.f32.mrb[3].mxu1 }
 0x163   :  { %v524_v9 = vadd.f32 %v523_v25, %v233_v4 }
 0x164   :  { %743 = vtanh.f32 %v522_v23 }
 0x165   :  { %745 = vtanh.f32 %v453_v24 }
 0x166   :  { %747 = vpow2.f32 %v604_v29 }
 0x16e   :  { %v744_v33 = vpop.eup %743 }
 0x16f   :  { %v746_v35 = vpop.eup %745  ;;  %v537_v36 = vadd.f32 %v744_v33, %v451_v32 }
 0x170   :  { %v529_v37 = vadd.f32 %v746_v35, %v382_v34  ;;  %v748_v40 = vpop.eup %747 }
 0x171   :  { %v602_v38 = vmul.f32 -1.442695, %v537_v36  ;;  %v553_v42 = vadd.f32 1.0, %v748_v40 }
 0x172   :  { %v601_v39 = vmul.f32 -1.442695, %v529_v37 }
 0x173   :  { %749 = vpow2.f32 %v602_v38 }
 0x174   :  { %751 = vpow2.f32 %v601_v39 }
 0x175   :  { %753 = vrcp.f32 %v553_v42 }
 0x17d   :  { %v750_v44 = vpop.eup %749 }
 0x17e   :  { %v752_v45 = vpop.eup %751  ;;  %v541_v47 = vadd.f32 1.0, %v750_v44 }
 0x17f   :  { %v533_v49 = vadd.f32 1.0, %v752_v45  ;;  %v754_v50 = vpop.eup %753 }
 0x180   :  { %755 = vrcp.f32 %v541_v47  ;;  %v557_v51 = vsub.f32 1.0, %v754_v50 }
 0x181   :  { %757 = vrcp.f32 %v533_v49 }
 0x182   :  { %759 = vtanh.f32 %v380_v46  ;;  %v558_v58 = vmul.f32 %v557_v51, %v70_v15 }
 0x18a   :  { %v756_v52 = vpop.eup %755 }
 0x18b   :  { %v758_v53 = vpop.eup %757  ;;  %v559_v54 = vmul.f32 %v756_v52, %v754_v50 }
 0x18c   :  { %v760_v55 = vpop.eup %759  ;;  %v562_v57 = vmul.f32 %v758_v53, %v754_v50 }
 0x18d   :  { %v560_v59 = vmul.f32 %v760_v55, %v559_v54 }
 0x18e   :  { %v563_v61 = vsub.f32 1.0, %v562_v57  ;;  %v565_v62 = vmul.f32 %v760_v55, %v562_v57 }
 0x18f   :  { %v561_v63 = vadd.f32 %v560_v59, %v558_v58 }
 0x190   :  { %v564_v2 = vmul.f32 %v563_v61, %v70_v15 }
 0x192   :  { %v566_v5 = vadd.f32 %v565_v62, %v564_v2 }
 0x194   :  { %v571_v8 = vmul.f32 %v605_v3, %v566_v5  ;;  %583 = vst [vmem:[#allocation10 + $0x8] sm:$0xff] %v566_v5 }
 0x196   :  { %v572_v11 = vadd.f32 %v571_v8, %v311_v7 }
 0x198   :  { %v573_v13 = vadd.f32 %v572_v11, %v524_v9 }
 0x19a   :  { %v606_v14 = vmul.f32 -1.442695, %v573_v13 }
 0x19c   :  { %761 = vpow2.f32 %v606_v14 }
 0x19d   :  { %763 = vtanh.f32 %v561_v63 }
 0x1a6   :  { %v762_v10 = vpop.eup %761 }
 0x1a7   :  { %v577_v48 = vadd.f32 1.0, %v762_v10  ;;  %v764_v15 = vpop.eup %763 }
 0x1a9   :  { %765 = vrcp.f32 %v577_v48 }
 0x1b3   :  { %v766_v16 = vpop.eup %765 }
 0x1b4   :  { %v581_v17 = vmul.f32 %v766_v16, %v764_v15 }
 0x1b6   :  { %582 = vst [vmem:[#allocation10] sm:$0xff] %v581_v17 }
 0x1b7   :  { %866 = shalt.err (!%p863_p8)
}
 0x1b8   :  { %s867_s19 = scalar_lea.hbm %s1024_s5, 256 }
 0x1b9   :  { %p868_p9 = scmp.ne.s32.totalorder %s1024_s5, %s867_s19  ;;  %p871_p10 = scmp.lt.u32.totalorder %s867_s19, %s1024_s5 }
 0x1bb   :  { %p873_p11 = pnand %p871_p10, %p868_p9 }
 0x1bd   :  { %876 = shalt.err (!%p873_p11)
}
 0x1be   :  { %593 = dma.vmem_to_hbm [thread:$0]  %s591_s15, 256, %s1024_s5, [#allocation4]  }
 0x1bf   :  { %883 = dma.done.wait [#allocation4], 256  }
 0x1c0   :  { %884 = vsyncadd [#allocation4], 4294967040 }
 0x1c1   :  { %597 = vsyncpa [#allocation3], 1 }
 0x1c2   :  { %598 = vsyncpa [#allocation6], 1 }
 0x1c3   :  { %599 = vsyncpa [#allocation9], 1 }
 0x1c4   :  { %600 = vsyncpa [#allocation4], 1 }

</bundles_post_ra>
